<compile_context>
chip_gen: v7x
topology: tpu7x:2x2x1
jax: 0.10.0
libtpu: 0.0.40
codegen_flags: <defaults>
</compile_context>

<pallas_src>
import functools

import jax
import jax.numpy as jnp
from jax.experimental import pallas as pl
from jax.experimental.pallas import tpu as pltpu


# --------------------------------------------------------------------------- #
# Kernel body
# --------------------------------------------------------------------------- #
def _expert_ffn_kernel(x_ref, w1_ref, b1_ref, w2_ref, b2_ref, o_ref, acc_ref):
    """One grid step = (expert e, token tile t, hidden tile h).

    Computes the partial contribution of one hidden (d_ff) tile to
    gelu(x @ W1 + b1) @ W2 + b2 and accumulates it into an f32 VMEM scratch.
    The output block stays resident across the innermost (reduction) axis.
    """
    h_idx = pl.program_id(2)

    @pl.when(h_idx == 0)
    def _init():
        acc_ref[...] = jnp.zeros_like(acc_ref)

    b, tc, d = x_ref.shape                    # (B, tc, D) block
    x = x_ref[...].reshape(b * tc, d)         # free reshape: tc is sublane-aligned
    w1 = w1_ref[0]                            # (D, th)
    w2 = w2_ref[0]                            # (th, D)

    # Feed the MXU low-precision operands when the weights are bf16/f16
    # (2-4x MXU throughput on all generations); accumulation stays f32.
    if (jnp.issubdtype(w1.dtype, jnp.floating)
            and jnp.dtype(w1.dtype).itemsize < jnp.dtype(x.dtype).itemsize):
        x = x.astype(w1.dtype)

    # First matmul + bias + GELU for this hidden tile, f32 epilogue.
    h = jnp.dot(x, w1, preferred_element_type=jnp.float32)
    h += b1_ref[0].astype(jnp.float32)        # (1, th) broadcast, once per step
    h = jax.nn.gelu(h, approximate=True)

    # Second matmul: accumulate partial sums over the hidden dimension.
    acc_ref[...] += jnp.dot(h.astype(w2.dtype), w2,
                            preferred_element_type=jnp.float32)

    @pl.when(h_idx == pl.num_programs(2) - 1)
    def _finalize():
        out = acc_ref[...] + b2_ref[0].astype(jnp.float32)   # (Tm, D) + (1, D)
        o_ref[...] = out.reshape(b, tc, d).astype(o_ref.dtype)


# --------------------------------------------------------------------------- #
# Generation-aware tile selection
# --------------------------------------------------------------------------- #
def _sublane_multiple(dtype):
    """Rows per sublane group for this dtype: f32 -> 8, bf16 -> 16, int8 -> 32."""
    return max(8, 32 // jnp.dtype(dtype).itemsize)


def _aligned_divisors(n, multiple):
    """Divisors of n that are multiples of `multiple`, descending.
    Falls back to [n] when no aligned divisor exists (small / odd dims)."""
    divs = [d for d in range(multiple, n + 1, multiple) if n % d == 0]
    return sorted(divs, reverse=True) if divs else [n]


def _vmem_footprint_bytes(B, tc, D, th, x_itemsize, w_itemsize):
    """Estimated VMEM usage for one pipelined step at tile sizes (tc, th)."""
    Tm = B * tc
    x_out = 2 * 2 * B * tc * D * x_itemsize                   # x + out, double-buffered
    weights = 2 * (D * th + th * D + th + D) * w_itemsize     # W1,W2,b1,b2 double-buffered
    acc = Tm * D * 4                                          # f32 accumulator scratch
    internal = Tm * th * (4 + w_itemsize)                     # f32 `h` temp + its cast copy
    return x_out + weights + acc + internal


def _vmem_limit_bytes():
    """Scoped-VMEM limit derived from the actual chip: ~96 MiB on the 128 MiB
    v5e/v6e parts, ~48 MiB on v7x's 64 MiB per-core VMEM."""
    try:
        cap = pltpu.get_tpu_info().vmem_capacity_bytes
    except Exception:
        cap = 64 * 1024 * 1024        # conservative fallback (v7x per-core VMEM)
    return int(cap) * 3 // 4


def _choose_tiles(B, C, D, H, x_dtype, w_dtype, budget):
    """Pick (tc, th).  Largest tc first — ideally tc == C so n_t == 1 and each
    expert's weights are streamed from HBM once — then the largest lane-aligned
    th that fits (fewer accumulator read-modify-write passes / grid steps)."""
    x_sz = jnp.dtype(x_dtype).itemsize
    w_sz = jnp.dtype(w_dtype).itemsize
    tc_cands = _aligned_divisors(C, _sublane_multiple(x_dtype))
    th_cands = _aligned_divisors(H, 128)
    for tc in tc_cands:
        for th in th_cands:
            if _vmem_footprint_bytes(B, tc, D, th, x_sz, w_sz) <= budget:
                return tc, th
    # Nothing fits the budget (pathological shapes): fall back to the smallest
    # aligned tiles — correct, the compiler may reduce buffering / spill.
    return tc_cands[-1], th_cands[-1]


# --------------------------------------------------------------------------- #
# Forward wrapper
# --------------------------------------------------------------------------- #
@functools.partial(jax.jit,
                   static_argnames=("num_experts", "tc", "th", "vmem_limit"))
def _experts_forward_impl(inputs, w1, b1, w2, b2, *,
                          num_experts, tc, th, vmem_limit):
    B, S, D = inputs.shape
    E = num_experts
    C = S // E
    H = w1.shape[-1]
    n_t = C // tc
    n_h = H // th
    Tm = B * tc

    isz = lambda a: a.dtype.itemsize
    weight_bytes = (w1.size * isz(w1) + b1.size * isz(b1)
                    + w2.size * isz(w2) + b2.size * isz(b2))
    cost = pl.CostEstimate(
        flops=4 * E * B * C * D * H,                      # two matmuls per token
        transcendentals=E * B * C * H,                    # gelu per hidden activation
        # Weights are re-streamed once per token tile (n_t, usually 1);
        # activations are read + written once.
        bytes_accessed=2 * inputs.size * isz(inputs) + n_t * weight_bytes,
    )

    return pl.pallas_call(
        _expert_ffn_kernel,
        out_shape=jax.ShapeDtypeStruct((B, S, D), inputs.dtype),
        grid_spec=pltpu.PrefetchScalarGridSpec(
            num_scalar_prefetch=0,
            grid=(E, n_t, n_h),
            in_specs=[
                # torch.chunk(inputs, E, dim=1): chunk e, token tile t is the
                # seq-block e*n_t + t of the ORIGINAL (B, S, D) tensor.
                pl.BlockSpec((B, tc, D), lambda e, t, h: (0, e * n_t + t, 0)),
                pl.BlockSpec((1, D, th), lambda e, t, h: (e, 0, h)),
                pl.BlockSpec((1, 1, th), lambda e, t, h: (e, 0, h)),
                pl.BlockSpec((1, th, D), lambda e, t, h: (e, h, 0)),
                pl.BlockSpec((1, 1, D), lambda e, t, h: (e, 0, 0)),
            ],
            # torch.cat(expert_output, dim=1): write each expert's chunk
            # straight back into its seq slice of the (B, S, D) output
            # (lane-dense: full D is the last dim).
            out_specs=pl.BlockSpec((B, tc, D),
                                   lambda e, t, h: (0, e * n_t + t, 0)),
            scratch_shapes=[pltpu.VMEM((Tm, D), jnp.float32)],
        ),
        compiler_params=pltpu.CompilerParams(
            # Expert axis leads and is parallel: on v7x the megacore split lands
            # on E first, giving each TensorCore disjoint expert weights.
            dimension_semantics=("parallel", "parallel", "arbitrary"),
            vmem_limit_bytes=vmem_limit,
        ),
        cost_estimate=cost,
    )(inputs, w1, b1, w2, b2)


def experts_forward(inputs, w1, b1, w2, b2, *, num_experts, tc=None, th=None):
    """inputs: (B, S, D) with S % num_experts == 0.
    w1: (E, D, H), b1: (E, 1, H), w2: (E, H, D), b2: (E, 1, D).
    Returns (B, S, D)."""
    B, S, D = inputs.shape
    E = num_experts
    assert S % E == 0, "seq dim must be divisible by num_local_experts (torch.chunk)"
    C = S // E                 # per-expert chunk size along dim=1
    H = w1.shape[-1]

    vmem_limit = _vmem_limit_bytes()
    if tc is None or th is None:
        auto_tc, auto_th = _choose_tiles(B, C, D, H, inputs.dtype, w1.dtype,
                                         int(vmem_limit * 0.9))
        tc = auto_tc if tc is None else tc
        th = auto_th if th is None else th
    assert C % tc == 0 and H % th == 0, "tiles must divide chunk / hidden dims"

    return _experts_forward_impl(inputs, w1, b1, w2, b2,
                                 num_experts=E, tc=int(tc), th=int(th),
                                 vmem_limit=int(vmem_limit))


# --------------------------------------------------------------------------- #
# Pure-JAX reference (mirrors the PyTorch chunk / expert / cat loop)
# --------------------------------------------------------------------------- #
def _reference_forward(inputs, w1, b1, w2, b2, num_experts):
    chunks = jnp.split(inputs, num_experts, axis=1)
    outs = []
    for i in range(num_experts):
        h = jax.nn.gelu(chunks[i] @ w1[i] + b1[i], approximate=True)
        outs.append(h @ w2[i] + b2[i])
    return jnp.concatenate(outs, axis=1)


if __name__ == "__main__":
    # Small, MXU/lane-friendly demo shapes.
    B, E, C, D, H = 2, 4, 16, 128, 256
    S = E * C

    key = jax.random.PRNGKey(0)
    kx, k1, k2, k3, k4 = jax.random.split(key, 5)

    x = jax.random.normal(kx, (B, S, D), dtype=jnp.float32)

    # Deterministic nn.Linear-style init (uniform in +/- 1/sqrt(fan_in)).
    w1 = jax.random.uniform(k1, (E, D, H), jnp.float32, -1.0, 1.0) / jnp.sqrt(D)
    b1 = jax.random.uniform(k2, (E, 1, H), jnp.float32, -1.0, 1.0) / jnp.sqrt(D)
    w2 = jax.random.uniform(k3, (E, H, D), jnp.float32, -1.0, 1.0) / jnp.sqrt(H)
    b2 = jax.random.uniform(k4, (E, 1, D), jnp.float32, -1.0, 1.0) / jnp.sqrt(H)

    ref = _reference_forward(x, w1, b1, w2, b2, E)

    # 1) Auto-tiled path: tile selection collapses to n_t == 1, n_h == 1, so
    #    each expert's weights stream from HBM exactly once.
    out = jax.block_until_ready(
        experts_forward(x, w1, b1, w2, b2, num_experts=E))
    assert out.shape == (B, S, D)
    assert jnp.allclose(out, ref, atol=1e-4, rtol=1e-4), "auto-tile mismatch"

    # 2) Explicitly tiled path: exercises multiple token tiles and the hidden
    #    reduction/accumulation across n_h > 1 grid steps.
    out2 = jax.block_until_ready(
        experts_forward(x, w1, b1, w2, b2, num_experts=E, tc=8, th=128))
    assert jnp.allclose(out2, ref, atol=1e-4, rtol=1e-4), "tiled mismatch"

    print("KERNEL_OK")
</pallas_src>

<mosaic_0001>
module attributes {stable_mosaic.version = 11 : i64} {
  func.func @_expert_ffn_kernel(%arg0: i32, %arg1: i32, %arg2: i32, %arg3: memref<2x16x128xf32, #tpu.memory_space<vmem>>, %arg4: memref<1x128x256xf32, #tpu.memory_space<vmem>>, %arg5: memref<1x1x256xf32, #tpu.memory_space<vmem>>, %arg6: memref<1x256x128xf32, #tpu.memory_space<vmem>>, %arg7: memref<1x1x128xf32, #tpu.memory_space<vmem>>, %arg8: memref<2x16x128xf32, #tpu.memory_space<vmem>>, %arg9: memref<32x128xf32, #tpu.memory_space<vmem>>) attributes {dimension_semantics = [#tpu.dimension_semantics<parallel>, #tpu.dimension_semantics<parallel>, #tpu.dimension_semantics<arbitrary>], iteration_bounds = array<i64: 4, 1, 1>, scalar_prefetch = 0 : i64, scratch_operands = 1 : i64, tpu.core_type = #tpu.core_type<tc>, window_params = [{transform_indices = @transform_0, window_bounds = array<i64: 2, 16, 128>}, {transform_indices = @transform_1, window_bounds = array<i64: 1, 128, 256>}, {transform_indices = @transform_2, window_bounds = array<i64: 1, 1, 256>}, {transform_indices = @transform_3, window_bounds = array<i64: 1, 256, 128>}, {transform_indices = @transform_4, window_bounds = array<i64: 1, 1, 128>}, {transform_indices = @transform_5, window_bounds = array<i64: 2, 16, 128>}]} {
    %c0_i32 = arith.constant 0 : i32
    %0 = arith.cmpi eq, %arg2, %c0_i32 : i32
    %1 = arith.extui %0 : i1 to i32
    %c0_i32_0 = arith.constant 0 : i32
    %2 = arith.cmpi ne, %1, %c0_i32_0 : i32
    scf.if %2 {
      %cst_23 = arith.constant 0.000000e+00 : f32
      %34 = vector.broadcast %cst_23 : f32 to vector<32x128xf32>
      %c0_24 = arith.constant 0 : index
      %c0_25 = arith.constant 0 : index
      %35 = vector.load %arg9[%c0_24, %c0_25] : memref<32x128xf32, #tpu.memory_space<vmem>>, vector<32x128xf32>
      tpu.vector_store %arg9[%c0_24, %c0_25], %34 {strides = array<i32>} : memref<32x128xf32, #tpu.memory_space<vmem>>, vector<32x128xf32>,
    } else {
    }
    %c0 = arith.constant 0 : index
    %c0_1 = arith.constant 0 : index
    %c0_2 = arith.constant 0 : index
    %3 = vector.load %arg3[%c0, %c0_1, %c0_2] : memref<2x16x128xf32, #tpu.memory_space<vmem>>, vector<2x16x128xf32>
    %4 = vector.shape_cast %3 : vector<2x16x128xf32> to vector<32x128xf32>
    %c0_3 = arith.constant 0 : index
    %c0_4 = arith.constant 0 : index
    %c0_5 = arith.constant 0 : index
    %5 = vector.load %arg4[%c0_3, %c0_4, %c0_5] : memref<1x128x256xf32, #tpu.memory_space<vmem>>, vector<1x128x256xf32>
    %6 = vector.shape_cast %5 : vector<1x128x256xf32> to vector<128x256xf32>
    %c0_6 = arith.constant 0 : index
    %c0_7 = arith.constant 0 : index
    %c0_8 = arith.constant 0 : index
    %7 = vector.load %arg6[%c0_6, %c0_7, %c0_8] : memref<1x256x128xf32, #tpu.memory_space<vmem>>, vector<1x256x128xf32>
    %8 = vector.shape_cast %7 : vector<1x256x128xf32> to vector<256x128xf32>
    %cst = arith.constant dense<0.000000e+00> : vector<32x256xf32>
    %9 = tpu.matmul %4, %6, %cst {dimension_numbers = #tpu.dot_dimension_numbers<[1], [0], [0], [1], [0, 0, 1, 1], [], []>} : vector<32x128xf32>, vector<128x256xf32>, vector<32x256xf32> -> vector<32x256xf32>
    %c0_9 = arith.constant 0 : index
    %c0_10 = arith.constant 0 : index
    %c0_11 = arith.constant 0 : index
    %10 = vector.load %arg5[%c0_9, %c0_10, %c0_11] : memref<1x1x256xf32, #tpu.memory_space<vmem>>, vector<1x1x256xf32>
    %11 = vector.shape_cast %10 : vector<1x1x256xf32> to vector<1x256xf32>
    %12 = vector.broadcast %11 : vector<1x256xf32> to vector<32x256xf32>
    %13 = arith.addf %9, %12 : vector<32x256xf32>
    %14 = arith.mulf %13, %13 : vector<32x256xf32>
    %15 = arith.mulf %13, %14 : vector<32x256xf32>
    %cst_12 = arith.constant 4.471500e-02 : f32
    %16 = vector.broadcast %cst_12 : f32 to vector<32x256xf32>
    %17 = arith.mulf %16, %15 : vector<32x256xf32>
    %18 = arith.addf %13, %17 : vector<32x256xf32>
    %cst_13 = arith.constant 0.797884583 : f32
    %19 = vector.broadcast %cst_13 : f32 to vector<32x256xf32>
    %20 = arith.mulf %19, %18 : vector<32x256xf32>
    %21 = math.tanh %20 : vector<32x256xf32>
    %cst_14 = arith.constant 1.000000e+00 : f32
    %22 = vector.broadcast %cst_14 : f32 to vector<32x256xf32>
    %23 = arith.addf %22, %21 : vector<32x256xf32>
    %cst_15 = arith.constant 5.000000e-01 : f32
    %24 = vector.broadcast %cst_15 : f32 to vector<32x256xf32>
    %25 = arith.mulf %24, %23 : vector<32x256xf32>
    %26 = arith.mulf %13, %25 : vector<32x256xf32>
    %c0_16 = arith.constant 0 : index
    %c0_17 = arith.constant 0 : index
    %27 = vector.load %arg9[%c0_16, %c0_17] : memref<32x128xf32, #tpu.memory_space<vmem>>, vector<32x128xf32>
    %cst_18 = arith.constant dense<0.000000e+00> : vector<32x128xf32>
    %28 = tpu.matmul %26, %8, %cst_18 {dimension_numbers = #tpu.dot_dimension_numbers<[1], [0], [0], [1], [0, 0, 1, 1], [], []>} : vector<32x256xf32>, vector<256x128xf32>, vector<32x128xf32> -> vector<32x128xf32>
    %29 = arith.addf %27, %28 : vector<32x128xf32>
    %c0_19 = arith.constant 0 : index
    %c0_20 = arith.constant 0 : index
    %30 = vector.load %arg9[%c0_19, %c0_20] : memref<32x128xf32, #tpu.memory_space<vmem>>, vector<32x128xf32>
    tpu.vector_store %arg9[%c0_19, %c0_20], %29 {strides = array<i32>} : memref<32x128xf32, #tpu.memory_space<vmem>>, vector<32x128xf32>,
    %c0_i32_21 = arith.constant 0 : i32
    %31 = arith.cmpi eq, %arg2, %c0_i32_21 : i32
    %32 = arith.extui %31 : i1 to i32
    %c0_i32_22 = arith.constant 0 : i32
    %33 = arith.cmpi ne, %32, %c0_i32_22 : i32
    scf.if %33 {
      %c0_23 = arith.constant 0 : index
      %c0_24 = arith.constant 0 : index
      %34 = vector.load %arg9[%c0_23, %c0_24] : memref<32x128xf32, #tpu.memory_space<vmem>>, vector<32x128xf32>
      %c0_25 = arith.constant 0 : index
      %c0_26 = arith.constant 0 : index
      %c0_27 = arith.constant 0 : index
      %35 = vector.load %arg7[%c0_25, %c0_26, %c0_27] : memref<1x1x128xf32, #tpu.memory_space<vmem>>, vector<1x1x128xf32>
      %36 = vector.shape_cast %35 : vector<1x1x128xf32> to vector<1x128xf32>
      %37 = vector.broadcast %36 : vector<1x128xf32> to vector<32x128xf32>
      %38 = arith.addf %34, %37 : vector<32x128xf32>
      %39 = vector.shape_cast %38 : vector<32x128xf32> to vector<2x16x128xf32>
      %c0_28 = arith.constant 0 : index
      %c0_29 = arith.constant 0 : index
      %c0_30 = arith.constant 0 : index
      %40 = vector.load %arg8[%c0_28, %c0_29, %c0_30] : memref<2x16x128xf32, #tpu.memory_space<vmem>>, vector<2x16x128xf32>
      tpu.vector_store %arg8[%c0_28, %c0_29, %c0_30], %39 {strides = array<i32>} : memref<2x16x128xf32, #tpu.memory_space<vmem>>, vector<2x16x128xf32>,
    } else {
    }
    return
  }
  func.func @transform_0(%arg0: i32, %arg1: i32, %arg2: i32) -> (i32, i32, i32) {
    %c1_i32 = arith.constant 1 : i32
    %0 = arith.muli %arg0, %c1_i32 : i32
    %1 = arith.addi %0, %arg1 : i32
    %c0_i32 = arith.constant 0 : i32
    %c0_i32_0 = arith.constant 0 : i32
    %c0_i32_1 = arith.constant 0 : i32
    return %c0_i32, %1, %c0_i32_0 : i32, i32, i32
  }
  func.func @transform_1(%arg0: i32, %arg1: i32, %arg2: i32) -> (i32, i32, i32) {
    %c0_i32 = arith.constant 0 : i32
    %c0_i32_0 = arith.constant 0 : i32
    return %arg0, %c0_i32, %arg2 : i32, i32, i32
  }
  func.func @transform_2(%arg0: i32, %arg1: i32, %arg2: i32) -> (i32, i32, i32) {
    %c0_i32 = arith.constant 0 : i32
    %c0_i32_0 = arith.constant 0 : i32
    return %arg0, %c0_i32, %arg2 : i32, i32, i32
  }
  func.func @transform_3(%arg0: i32, %arg1: i32, %arg2: i32) -> (i32, i32, i32) {
    %c0_i32 = arith.constant 0 : i32
    %c0_i32_0 = arith.constant 0 : i32
    return %arg0, %arg2, %c0_i32 : i32, i32, i32
  }
  func.func @transform_4(%arg0: i32, %arg1: i32, %arg2: i32) -> (i32, i32, i32) {
    %c0_i32 = arith.constant 0 : i32
    %c0_i32_0 = arith.constant 0 : i32
    %c0_i32_1 = arith.constant 0 : i32
    return %arg0, %c0_i32, %c0_i32_0 : i32, i32, i32
  }
  func.func @transform_5(%arg0: i32, %arg1: i32, %arg2: i32) -> (i32, i32, i32) {
    %c1_i32 = arith.constant 1 : i32
    %0 = arith.muli %arg0, %c1_i32 : i32
    %1 = arith.addi %0, %arg1 : i32
    %c0_i32 = arith.constant 0 : i32
    %c0_i32_0 = arith.constant 0 : i32
    %c0_i32_1 = arith.constant 0 : i32
    return %c0_i32, %1, %c0_i32_0 : i32, i32, i32
  }
}

</mosaic_0001>

<bundles_post_ra>
// kernel: _experts_forward_impl.1
= control target key start
LH: loop header
LB: loop body
LE: loop exit
PB: predicated region body
PF: predicated region fallthrough
CT: control target
= control target key end

     0   :  { %s1867_s0 = inlined_call_operand.hbm [shape: f32[2,64,128], index: 0, kind: input, shape index: {}]   ;;  %s1868_s1 = inlined_call_operand.hbm [shape: f32[4,128,256], index: 1, kind: input, shape index: {}]   ;;  %s1869_s2 = inlined_call_operand.hbm [shape: f32[4,1,256], index: 2, kind: input, shape index: {}]   ;;  %s1870_s3 = inlined_call_operand.hbm [shape: f32[4,256,128], index: 3, kind: input, shape index: {}]   ;;  %s1871_s4 = inlined_call_operand.vmem [shape: f32[4,1,128], index: 4, kind: input, shape index: {}]   ;;  %s1872_s5 = inlined_call_operand.hbm [shape: f32[2,64,128], index: 5, kind: output, shape index: {}]  }
   0x1   :  { %1878 = sst [smem:[#allocation22_spill]] %s1867_s0 }
   0x2   :  { %10 = vsyncpa [#allocation4], 0 }
   0x3   :  { %12 = vsyncpa [#allocation4 + $0x1], 0 }
   0x4   :  { %13 = vsyncpa [#allocation7], 0 }
   0x5   :  { %15 = vsyncpa [#allocation7 + $0x1], 0 }
   0x6   :  { %16 = vsyncpa [#allocation10], 0 }
   0x7   :  { %18 = vsyncpa [#allocation10 + $0x1], 0 }
   0x8   :  { %19 = vsyncpa [#allocation5], 0 }
   0x9   :  { %21 = vsyncpa [#allocation5 + $0x1], 0  ;;  %s1474_s18 = smov 0   ;;  %s1476_s19 = smov 0  }
   0xa   :  { %s1478_s20 = smov 0   ;;  %s1480_s21 = smov 0  }
   0xb   :  { %s1482_s22 = smov 0   ;;  %s1484_s23 = smov 0  }
   0xc LB: > { %s1505_s24 = sadd.s32 4294967295, %s1421_s23   ;;  %s1023_s25 = sadd.s32 4294967294, %s1421_s23   ;;  %s1421_s23 = sphi %s1484_s23, %s27_s23   ;;  %s1417_s22 = sphi %s1482_s22, %s1895_s22   ;;  %s1413_s21 = sphi %s1480_s21, %s1894_s21   ;;  %s1409_s20 = sphi %s1478_s20, %s1893_s20   ;;  %s1405_s19 = sphi %s1476_s19, %s1892_s19   ;;  %s1401_s18 = sphi %s1474_s18, %s1891_s18  }
   0xd   : > { %s46_s26 = sadd.s32 1, %s1417_s22  ;;  %s55_s27 = sadd.s32 1, %s1409_s20 }
   0xe   : > { %p48_p0 = scmp.ge.s32.totalorder %s46_s26, 4  ;;  %p62_p1 = scmp.ne.s32.totalorder %s1409_s20, %s1405_s19 }
   0xf   : > { %p63_p2 = scmp.eq.s32.totalorder %s1421_s23, 0  ;;  %p68_p3 = scmp.ne.s32.totalorder %s1405_s19, %s1401_s18 }
  0x10   : > { %s1897_s26 = smov (%p48_p0, %s46_s26), 0  ;;  %p69_p5 = scmp.eq.s32.totalorder %s1505_s24, 0 }
  0x11   : > { %1879 = sst [smem:[#allocation21_spill]] %s1897_s26  ;;  %p1517_p4 = por %p63_p2, %p62_p1 }
  0x12   : > { %s52_s29 = ssub.s32 %s1417_s22, %s1897_s26  ;;  %p204_p6 = scmp.eq.s32.totalorder %s1505_s24, 3 }
  0x13   : > { %p53_p7 = scmp.eq.s32.totalorder %s52_s29, 0  ;;  %p1525_p8 = por %p69_p5, %p68_p3 }
  0x14   : > { %p1529_p9 = por %p204_p6, %p62_p1  ;;  %p210_p10 = scmp.eq.s32.totalorder %s1023_s25, 3 }
  0x15   : > { %s1881_s30 = scalar_select %p1525_p8, 1, 0 }
  0x16   : > { %s1882_s6 = scalar_select %p1529_p9, 1, 0 }
  0x17   : > { %s1534_s7 = scalar_select %p53_p7, %s1409_s20, %s55_s27  }
  0x18   : > { %p1536_p11 = por %p210_p10, %p68_p3  ;;  %p1025_p12 = scmp.ge.s32.totalorder %s1421_s23, 4 }
  0x1a   : > { %s1883_s8 = scalar_select %p1536_p11, 1, 0 }
  0x1b   : > { %226 = sbr.rel (%p1025_p12) target bundleno = 124 (0x7c), region = 16 }
  0x22   : > { %s1542_s9 = sand.u32 1, %s1409_s20   ;;  %s1052_s10 = sshll.u32 %s1417_s22, 8 }
  0x23   : > { %s1026_s11 = sshll.u32 %s1542_s9, 5  ;;  %s1884_s0 = sld [smem:[#allocation22_spill]] }
  0x24   : > { %s1165_s15 = scalar_select %p1517_p4, [#allocation0], [#allocation16] }
  0x25   : > { %s234_s16 = scalar_lea.vmem [#allocation3], %s1026_s11  ;;  %s1423_s27 = smov 1024  }
  0x26   : > { %s254_s17 = sshll.u32 %s234_s16, 4  ;;  %s246_s25 = sld [smem:[%s1165_s15]]   ;;  %s255_s17 = int_to_ptr.vmem [resolvable:$true] %s254_s17 }
  0x27   : > { %1166 = sst [smem:[#allocation13]] (%p1517_p4), %s1423_s27  ;;  %s1424_s29 = smov 256  }
  0x28   : > { %1167 = sst [smem:[#allocation13 + $0x1]] (%p1517_p4), %s1424_s29  ;;  %s1425_s26 = smov 2  }
  0x29   : > { %s241_s14 = scalar_lea.hbm %s1884_s0, %s1052_s10  ;;  %1168 = sst [smem:[#allocation13 + $0x2]] (%p1517_p4), %s1425_s26 }
  0x2a   : > { %s1426_s12 = smov 128   ;;  %s1427_s11 = smov 8  }
  0x2b   : > { %1169 = sst [smem:[#allocation13 + $0x3]] (%p1517_p4), %s1426_s12  ;;  %s231_s15 = scalar_lea.sflag [#allocation4], %s1542_s9 }
  0x2c   : > { %1170 = sst [smem:[#allocation13 + $0x4]] (%p1517_p4), %s1426_s12  ;;  %s1029_s10 = sshll.u32 %s246_s25, 26 }
  0x2d   : > { %1171 = sst [smem:[#allocation13 + $0x5]] (%p1517_p4), %s1427_s11  ;;  %s1030_s13 = sadd.s32 134217728, %s1029_s10 }
  0x2e   : > { %s1428_s16 = smov [#allocation12]   ;;  %s277_s26 = sand.u32 1, %s1421_s23  }
  0x2f   : > { %1172 = dma.general (%p1517_p4), %s241_s14, 512, %s255_s17, %s231_s15, %s1428_s16, [#allocation13], %s1030_s13, 0  }
  0x30   : > { %s1875_s27 = sshll.u32 %s1542_s9, 8  ;;  %s1876_s29 = sshll.u32 %s1417_s22, 12 }
  0x31   : > { %s281_s12 = scalar_lea.vmem [#allocation6], %s1875_s27  ;;  %s1576_s10 = scalar_lea.hbm %s1868_s1, %s1876_s29 }
  0x32   : > { %s290_s25 = sshll.u32 %s281_s12, 4  ;;  %s1580_s14 = scalar_lea.sflag [#allocation7], %s277_s26  ;;  %s1578_s25 = int_to_ptr.vmem [resolvable:$true] %s290_s25 }
  0x33   : > { %s1275_s17 = scalar_lea.hbm %s1576_s10, 4096  ;;  %s1279_s16 = scalar_lea.hbm %s1868_s1, 16384 }
  0x34   : > { %p1276_p13 = scmp.ne.s32.totalorder %s1576_s10, %s1275_s17  ;;  %p1280_p2 = scmp.lt.u32.totalorder %s1576_s10, %s1868_s1 }
  0x35   : > { %p1281_p3 = scmp.lt.u32.totalorder %s1279_s16, %s1275_s17  ;;  %p1283_p6 = scmp.lt.u32.totalorder %s1275_s17, %s1576_s10 }
  0x36   : > { %p1277_p0 = pnand %p1276_p13, %p1517_p4 }
  0x37   : > { %p1282_p5 = por %p1281_p3, %p1280_p2 }
  0x38   : > { %p1278_p1 = pneg %p1277_p0 }
  0x39   : > { %p1284_p7 = por %p1283_p6, %p1282_p5 }
  0x3b   : > { %p1285_p10 = pnand %p1284_p7, %p1278_p1 }
  0x3d   : > { %1288 = shalt.err (!%p1285_p10)
}
  0x3e   : > { %s1289_s26 = scalar_lea.vmem %s1578_s25, 4096  ;;  %s1429_s11 = smov [#allocation6]  }
  0x3f   : > { %p1290_p12 = scmp.ne.s32.totalorder %s1578_s25, %s1289_s26  ;;  %s1293_s13 = sshll.u32 %s1429_s11, 4  ;;  %s1294_s13 = int_to_ptr.vmem [resolvable:$false] %s1293_s13 }
  0x40   : > { %s1295_s15 = scalar_lea.vmem %s1294_s13, 8192  ;;  %p1296_p11 = scmp.lt.s32.totalorder %s1578_s25, %s1294_s13 }
  0x41   : > { %p1291_p13 = pnand %p1290_p12, %p1517_p4  ;;  %p1297_p9 = scmp.lt.s32.totalorder %s1295_s15, %s1289_s26 }
  0x43   : > { %p1292_p0 = pneg %p1291_p13  ;;  %p1298_p2 = por %p1297_p9, %p1296_p11 }
  0x45   : > { %p1299_p3 = pnand %p1298_p2, %p1292_p0 }
  0x47   : > { %1302 = shalt.err (!%p1299_p3)
}
  0x48   : > { %s1430_s17 = smov 256   ;;  %s1431_s16 = smov 16  }
  0x49   : > { %1173 = dma.hbm_to_vmem [thread:$0]  (%p1517_p4), %s1576_s10, 4096, %s1578_s25, %s1580_s14, %s1430_s17, %s1430_s17, %s1431_s16  }
  0x4a   : > { %s1034_s0 = sshll.u32 %s1542_s9, 1  ;;  %s1054_s12 = sshll.u32 %s1417_s22, 5 }
  0x4b   : > { %s1609_s26 = scalar_lea.hbm %s1869_s2, %s1054_s12  ;;  %s304_s13 = scalar_lea.vmem [#allocation8], %s1034_s0 }
  0x4c   : > { %s314_s15 = sshll.u32 %s304_s13, 4  ;;  %s1303_s29 = scalar_lea.hbm %s1609_s26, 32  ;;  %s315_s15 = int_to_ptr.vmem [resolvable:$true] %s314_s15 }
  0x4d   : > { %p1304_p9 = scmp.ne.s32.totalorder %s1609_s26, %s1303_s29  ;;  %s1307_s17 = scalar_lea.hbm %s1869_s2, 128 }
  0x4e   : > { %p1308_p5 = scmp.lt.u32.totalorder %s1609_s26, %s1869_s2  ;;  %p1309_p6 = scmp.lt.u32.totalorder %s1307_s17, %s1303_s29 }
  0x4f   : > { %p1305_p11 = pnand %p1304_p9, %p1517_p4  ;;  %p1311_p10 = scmp.lt.u32.totalorder %s1303_s29, %s1609_s26 }
  0x50   : > { %p1310_p7 = por %p1309_p6, %p1308_p5 }
  0x51   : > { %p1306_p1 = pneg %p1305_p11 }
  0x52   : > { %p1312_p12 = por %p1311_p10, %p1310_p7 }
  0x54   : > { %p1313_p13 = pnand %p1312_p12, %p1306_p1 }
  0x56   : > { %1316 = shalt.err (!%p1313_p13)
}
  0x57   : > { %s1317_s0 = scalar_lea.vmem %s315_s15, 32  ;;  %s1432_s12 = smov [#allocation8]  }
  0x58   : > { %p1318_p0 = scmp.ne.s32.totalorder %s315_s15, %s1317_s0  ;;  %s1321_s11 = sshll.u32 %s1432_s12, 4  ;;  %s1322_s11 = int_to_ptr.vmem [resolvable:$false] %s1321_s11 }
  0x59   : > { %s1323_s13 = scalar_lea.vmem %s1322_s11, 64  ;;  %p1324_p9 = scmp.lt.s32.totalorder %s315_s15, %s1322_s11 }
  0x5a   : > { %p1319_p2 = pnand %p1318_p0, %p1517_p4  ;;  %p1325_p11 = scmp.lt.s32.totalorder %s1323_s13, %s1317_s0 }
  0x5c   : > { %p1320_p3 = pneg %p1319_p2  ;;  %p1326_p8 = por %p1325_p11, %p1324_p9 }
  0x5e   : > { %p1327_p5 = pnand %p1326_p8, %p1320_p3 }
  0x60   : > { %1330 = shalt.err (!%p1327_p5)
}
  0x61   : > { %1174 = dma.hbm_to_vmem [thread:$0]  (%p1517_p4), %s1609_s26, 32, %s315_s15, %s1580_s14  }
  0x62   : > { %s1885_s29 = sshll.u32 %s1417_s22, 12  ;;  %s1886_s16 = sshll.u32 %s1542_s9, 8 }
  0x63   : > { %s1634_s17 = scalar_lea.hbm %s1870_s3, %s1885_s29  ;;  %s325_s27 = scalar_lea.vmem [#allocation9], %s1886_s16 }
  0x64   : > { %s334_s0 = sshll.u32 %s325_s27, 4  ;;  %s322_s12 = scalar_lea.sflag [#allocation10], %s1542_s9  ;;  %s1638_s0 = int_to_ptr.vmem [resolvable:$true] %s334_s0 }
  0x65   : > { %s1331_s11 = scalar_lea.hbm %s1634_s17, 4096  ;;  %s1335_s15 = scalar_lea.hbm %s1870_s3, 16384 }
  0x66   : > { %p1332_p8 = scmp.ne.s32.totalorder %s1634_s17, %s1331_s11  ;;  %p1336_p7 = scmp.lt.u32.totalorder %s1634_s17, %s1870_s3 }
  0x67   : > { %p1337_p10 = scmp.lt.u32.totalorder %s1335_s15, %s1331_s11  ;;  %p1339_p13 = scmp.lt.u32.totalorder %s1331_s11, %s1634_s17 }
  0x68   : > { %p1333_p1 = pnand %p1332_p8, %p1517_p4 }
  0x69   : > { %p1338_p12 = por %p1337_p10, %p1336_p7 }
  0x6a   : > { %p1334_p6 = pneg %p1333_p1 }
  0x6b   : > { %p1340_p0 = por %p1339_p13, %p1338_p12 }
  0x6d   : > { %p1341_p2 = pnand %p1340_p0, %p1334_p6 }
  0x6f   : > { %1344 = shalt.err (!%p1341_p2)
}
  0x70   : > { %s1345_s25 = scalar_lea.vmem %s1638_s0, 4096  ;;  %s1433_s10 = smov [#allocation9]  }
  0x71   : > { %p1346_p3 = scmp.ne.s32.totalorder %s1638_s0, %s1345_s25  ;;  %s1349_s16 = sshll.u32 %s1433_s10, 4  ;;  %s1350_s16 = int_to_ptr.vmem [resolvable:$false] %s1349_s16 }
  0x72   : > { %s1351_s27 = scalar_lea.vmem %s1350_s16, 8192  ;;  %p1352_p5 = scmp.lt.s32.totalorder %s1638_s0, %s1350_s16 }
  0x73   : > { %p1347_p9 = pnand %p1346_p3, %p1517_p4  ;;  %p1353_p8 = scmp.lt.s32.totalorder %s1351_s27, %s1345_s25 }
  0x75   : > { %p1348_p11 = pneg %p1347_p9  ;;  %p1354_p1 = por %p1353_p8, %p1352_p5 }
  0x77   : > { %p1355_p7 = pnand %p1354_p1, %p1348_p11 }
  0x79   : > { %1358 = shalt.err (!%p1355_p7)
}
  0x7a   : > { %s1434_s11 = smov 128   ;;  %s1435_s14 = smov 8  }
  0x7b   : > { %1175 = dma.hbm_to_vmem [thread:$0]  (%p1517_p4), %s1634_s17, 4096, %s1638_s0, %s322_s12, %s1434_s11, %s1434_s11, %s1435_s14  }
  0x7c PF: > { %p1040_p6 = scmp.ge.s32.totalorder %s1421_s23, 1  ;;  %p348_p10 = scmp.lt.s32.totalorder %s1421_s23, 5 }
  0x7e   : > { %p349_p12 = pnand %p1040_p6, %p348_p10 }
  0x7f   : > { %s1667_s26 = sand.u32 (!%p349_p12), 1, %s1405_s19   ;;  %p1887_p4 = scmp.ne.s32.totalorder (!%p349_p12), %s1881_s30, 0 }
  0x80   : > { %352 = sbr.rel (%p349_p12) target bundleno = 661 (0x295), region = 40  ;;  %s1041_s15 = sshll.u32 (!%p349_p12), %s1667_s26, 5 }
  0x81   : > { %s355_s13 = scalar_lea.sflag (!%p349_p12), [#allocation4], %s1667_s26  ;;  %s1673_s28 = scalar_lea.vmem (!%p349_p12), [#allocation3], %s1041_s15 }
  0x87   : > { %1384 = dma.done.wait (%p1887_p4), %s355_s13, 512  }
  0x88   : > { %1386 = vsyncadd (%p1887_p4), %s355_s13, 4294966784  ;;  %s363_s9 = sand.u32 1, %s1505_s24   ;;  %s1042_s17 = sshll.u32 %s1667_s26, 8 }
  0x89   : > { %s364_s0 = scalar_lea.sflag [#allocation7], %s363_s9  ;;  %s1681_s12 = scalar_lea.vmem [#allocation6], %s1042_s17 }
  0x8a   : > { %1388 = dma.done.wait (%p1887_p4), %s364_s0, 4128  }
  0x8b   : > { %1390 = vsyncadd (%p1887_p4), %s364_s0, 4294963168  ;;  %s1043_s29 = sshll.u32 %s1667_s26, 1  ;;  %s382_s10 = scalar_lea.sflag [#allocation10], %s1667_s26 }
  0x8c   : > { %s1688_s25 = scalar_lea.vmem [#allocation8], %s1043_s29  ;;  %s1691_s16 = scalar_lea.vmem [#allocation9], %s1042_s17 }
  0x8d   : > { %1392 = dma.done.wait (%p1887_p4), %s382_s10, 4096  }
  0x8e   : > { %1394 = vsyncadd (%p1887_p4), %s382_s10, 4294963200  ;;  %v1436_v0 = vmov 0.0   ;;  %v453_v1 = vld [vmem:[%s1681_s12 + $0x8] sm:$0xff]  ;;  %v455_v2 = vld [vmem:[%s1681_s12 + $0x18] sm:$0xff]  ;;  %p435_p13 = scmp.lt.s32.totalorder %s1413_s21, 3  ;;  %s429_s14 = scalar_lea.vmem [#allocation11], %s1041_s15 }
  0x8f   : > { %592 = vmatprep.mubr.f32.mxu0 %v1436_v0  ;;  %v452_v3 = vld [vmem:[%s1681_s12] sm:$0xff]  ;;  %v1101_v4 = vpack.c.bf16 %v455_v2, %v453_v1  ;;  %v454_v5 = vld [vmem:[%s1681_s12 + $0x10] sm:$0xff]  ;;  %v457_v6 = vld [vmem:[%s1681_s12 + $0x28] sm:$0xff]  ;;  %s809_s13 = scalar_lea.sflag [#allocation5], %s1667_s26 }
  0x90   : > { %v459_v7 = vld [vmem:[%s1681_s12 + $0x38] sm:$0xff]  ;;  %v1103_v8 = vpack.c.bf16 %v454_v5, %v452_v3  ;;  %v456_v10 = vld [vmem:[%s1681_s12 + $0x20] sm:$0xff]  ;;  %v458_v11 = vld [vmem:[%s1681_s12 + $0x30] sm:$0xff]  ;;  %s436_s24 = scalar_select %p435_p13, %s1413_s21, 3 }
  0x91   : > { %v1105_v9 = vpack.c.bf16 %v459_v7, %v457_v6  ;;  %v461_v12 = vld [vmem:[%s1681_s12 + $0x48] sm:$0xff]  ;;  %1102 = vmatprep.subr.bf16.mxu0 %v1101_v4  ;;  %v463_v13 = vld [vmem:[%s1681_s12 + $0x58] sm:$0xff]  ;;  %v1107_v14 = vpack.c.bf16 %v458_v11, %v456_v10  ;;  %v460_v16 = vld [vmem:[%s1681_s12 + $0x40] sm:$0xff] }
  0x92   : > { %1104 = vmatpush1.bf16.msra.mxu0 %v1103_v8  ;;  %v1109_v15 = vpack.c.bf16 %v463_v13, %v461_v12  ;;  %v462_v17 = vld [vmem:[%s1681_s12 + $0x50] sm:$0xff]  ;;  %v465_v18 = vld [vmem:[%s1681_s12 + $0x68] sm:$0xff]  ;;  %v467_v19 = vld [vmem:[%s1681_s12 + $0x78] sm:$0xff]  ;;  %s437_s11 = scalar_lea.vmem %s1871_s4, %s436_s24 }
  0x93   : > { %1106 = vmatprep.subr.bf16.mxu0 %v1105_v9  ;;  %v1111_v20 = vpack.c.bf16 %v462_v17, %v460_v16  ;;  %v1113_v21 = vpack.c.bf16 %v467_v19, %v465_v18  ;;  %v464_v22 = vld [vmem:[%s1681_s12 + $0x60] sm:$0xff]  ;;  %v466_v23 = vld [vmem:[%s1681_s12 + $0x70] sm:$0xff]  ;;  %v469_v24 = vld [vmem:[%s1681_s12 + $0x88] sm:$0xff] }
  0x94   : > { %v471_v25 = vld [vmem:[%s1681_s12 + $0x98] sm:$0xff]  ;;  %v1115_v26 = vpack.c.bf16 %v466_v23, %v464_v22  ;;  %v468_v28 = vld [vmem:[%s1681_s12 + $0x80] sm:$0xff]  ;;  %v470_v29 = vld [vmem:[%s1681_s12 + $0x90] sm:$0xff] }
  0x95   : > { %v1117_v27 = vpack.c.bf16 %v471_v25, %v469_v24  ;;  %v473_v30 = vld [vmem:[%s1681_s12 + $0xa8] sm:$0xff]  ;;  %v475_v31 = vld [vmem:[%s1681_s12 + $0xb8] sm:$0xff]  ;;  %v1119_v32 = vpack.c.bf16 %v470_v29, %v468_v28  ;;  %v472_v34 = vld [vmem:[%s1681_s12 + $0xa0] sm:$0xff] }
  0x96   : > { %1108 = vmatpush1.bf16.msra.mxu0 %v1107_v14  ;;  %v1121_v33 = vpack.c.bf16 %v475_v31, %v473_v30  ;;  %v474_v35 = vld [vmem:[%s1681_s12 + $0xb0] sm:$0xff]  ;;  %v477_v36 = vld [vmem:[%s1681_s12 + $0xc8] sm:$0xff]  ;;  %v479_v37 = vld [vmem:[%s1681_s12 + $0xd8] sm:$0xff] }
  0x97   : > { %1110 = vmatprep.subr.bf16.mxu0 %v1109_v15  ;;  %v1123_v38 = vpack.c.bf16 %v474_v35, %v472_v34  ;;  %v1125_v39 = vpack.c.bf16 %v479_v37, %v477_v36  ;;  %v476_v40 = vld [vmem:[%s1681_s12 + $0xc0] sm:$0xff]  ;;  %v478_v41 = vld [vmem:[%s1681_s12 + $0xd0] sm:$0xff]  ;;  %v481_v42 = vld [vmem:[%s1681_s12 + $0xe8] sm:$0xff]  ;;  %v518_v37 = vlaneseq }
  0x98   : > { %v483_v43 = vld [vmem:[%s1681_s12 + $0xf8] sm:$0xff]  ;;  %v1127_v44 = vpack.c.bf16 %v478_v41, %v476_v40  ;;  %v480_v46 = vld [vmem:[%s1681_s12 + $0xe0] sm:$0xff]  ;;  %v482_v47 = vld [vmem:[%s1681_s12 + $0xf0] sm:$0xff] }
  0x99   : > { %v1129_v45 = vpack.c.bf16 %v483_v43, %v481_v42  ;;  %v1131_v48 = vpack.c.bf16 %v482_v47, %v480_v46  ;;  %v448_v49 = vld [vmem:[%s1673_s28] sm:$0xff]  ;;  %v449_v50 = vld [vmem:[%s1673_s28 + $0x8] sm:$0xff]  ;;  %v450_v51 = vld [vmem:[%s1673_s28 + $0x10] sm:$0xff] }
  0x9a   : > { %1112 = vmatpush1.bf16.msra.mxu0 %v1111_v20  ;;  %v451_v52 = vld [vmem:[%s1673_s28 + $0x18] sm:$0xff]  ;;  %v500_v53 = vld [vmem:[%s1691_s16 + $0x80] sm:$0xff]  ;;  %v501_v54 = vld [vmem:[%s1691_s16 + $0x88] sm:$0xff] }
  0x9b   : > { %1114 = vmatprep.subr.bf16.mxu0 %v1113_v21  ;;  %v1133_v55 = vpack.c.bf16 %v501_v54, %v500_v53  ;;  %v484_v56 = vld [vmem:[%s1691_s16] sm:$0xff]  ;;  %v485_v57 = vld [vmem:[%s1691_s16 + $0x8] sm:$0xff]  ;;  %v502_v59 = vld [vmem:[%s1691_s16 + $0x90] sm:$0xff] }
  0x9c   : > { %v1135_v58 = vpack.c.bf16 %v485_v57, %v484_v56  ;;  %v503_v60 = vld [vmem:[%s1691_s16 + $0x98] sm:$0xff]  ;;  %v486_v62 = vld [vmem:[%s1691_s16 + $0x10] sm:$0xff]  ;;  %v504_v1 = vld [vmem:[%s1691_s16 + $0xa0] sm:$0xff] }
  0x9d   : > { %1134 = vmatprep.subr.bf16.mxu1 %v1133_v55  ;;  %v1137_v61 = vpack.c.bf16 %v503_v60, %v502_v59  ;;  %v487_v63 = vld [vmem:[%s1691_s16 + $0x18] sm:$0xff]  ;;  %v505_v2 = vld [vmem:[%s1691_s16 + $0xa8] sm:$0xff]  ;;  %v488_v4 = vld [vmem:[%s1691_s16 + $0x20] sm:$0xff] }
  0x9e   : > { %1116 = vmatpush1.bf16.msra.mxu0 %v1115_v26  ;;  %1136 = vmatpush3.bf16.msra.mxu1 %v1135_v58  ;;  %v1141_v3 = vpack.c.bf16 %v505_v2, %v504_v1  ;;  %v489_v5 = vld [vmem:[%s1691_s16 + $0x28] sm:$0xff]  ;;  %v506_v7 = vld [vmem:[%s1691_s16 + $0xb0] sm:$0xff]  ;;  %v507_v8 = vld [vmem:[%s1691_s16 + $0xb8] sm:$0xff] }
  0x9f   : > { %1118 = vmatprep.subr.bf16.mxu0 %v1117_v27  ;;  %1138 = vmatprep.subr.bf16.mxu1 %v1137_v61  ;;  %v1143_v6 = vpack.c.bf16 %v489_v5, %v488_v4  ;;  %v1145_v9 = vpack.c.bf16 %v507_v8, %v506_v7  ;;  %v490_v10 = vld [vmem:[%s1691_s16 + $0x30] sm:$0xff]  ;;  %v491_v11 = vld [vmem:[%s1691_s16 + $0x38] sm:$0xff]  ;;  %v508_v13 = vld [vmem:[%s1691_s16 + $0xc0] sm:$0xff] }
  0xa0   : > { %v1147_v12 = vpack.c.bf16 %v491_v11, %v490_v10  ;;  %v509_v14 = vld [vmem:[%s1691_s16 + $0xc8] sm:$0xff]  ;;  %v492_v16 = vld [vmem:[%s1691_s16 + $0x40] sm:$0xff]  ;;  %v510_v19 = vld [vmem:[%s1691_s16 + $0xd0] sm:$0xff] }
  0xa1   : > { %v1149_v15 = vpack.c.bf16 %v509_v14, %v508_v13  ;;  %v493_v17 = vld [vmem:[%s1691_s16 + $0x48] sm:$0xff]  ;;  %v511_v20 = vld [vmem:[%s1691_s16 + $0xd8] sm:$0xff]  ;;  %v494_v22 = vld [vmem:[%s1691_s16 + $0x50] sm:$0xff] }
  0xa2   : > { %1120 = vmatpush1.bf16.msra.mxu0 %v1119_v32  ;;  %v1151_v18 = vpack.c.bf16 %v493_v17, %v492_v16  ;;  %v1153_v21 = vpack.c.bf16 %v511_v20, %v510_v19  ;;  %v495_v23 = vld [vmem:[%s1691_s16 + $0x58] sm:$0xff]  ;;  %v512_v25 = vld [vmem:[%s1691_s16 + $0xe0] sm:$0xff]  ;;  %v513_v26 = vld [vmem:[%s1691_s16 + $0xe8] sm:$0xff] }
  0xa3   : > { %1122 = vmatprep.subr.bf16.mxu0 %v1121_v33  ;;  %v1155_v24 = vpack.c.bf16 %v495_v23, %v494_v22  ;;  %v1157_v27 = vpack.c.bf16 %v513_v26, %v512_v25  ;;  %v496_v28 = vld [vmem:[%s1691_s16 + $0x60] sm:$0xff]  ;;  %v497_v29 = vld [vmem:[%s1691_s16 + $0x68] sm:$0xff]  ;;  %v514_v31 = vld [vmem:[%s1691_s16 + $0xf0] sm:$0xff] }
  0xa4   : > { %v1159_v30 = vpack.c.bf16 %v497_v29, %v496_v28  ;;  %v515_v32 = vld [vmem:[%s1691_s16 + $0xf8] sm:$0xff]  ;;  %v498_v33 = vld [vmem:[%s1691_s16 + $0x70] sm:$0xff] }
  0xa5   : > { %v1161_v34 = vpack.c.bf16 %v515_v32, %v514_v31  ;;  %v499_v35 = vld [vmem:[%s1691_s16 + $0x78] sm:$0xff] }
  0xa6   : > { %1124 = vmatpush1.bf16.msra.mxu0 %v1123_v38  ;;  %v1163_v36 = vpack.c.bf16 %v499_v35, %v498_v33  ;;  %v519_v38 = vshrl.u32 %v518_v37, 7  ;;  %v516_v40 = vld [vmem:[%s1688_s25] sm:$0x3] }
  0xa7   : > { %1126 = vmatprep.subr.bf16.mxu0 %v1125_v39 }
  0xa8   : > { %v520_v39 = vsub.s32 0, %v519_v38  ;;  %v524_v41 = vsub.s32 1, %v519_v38 }
  0xaa   : > { %1128 = vmatpush1.bf16.msra.mxu0 %v1127_v44  ;;  %v521_v42 = vrot.slane %v516_v40, %v520_v39  ;;  %v525_v43 = vrot.slane %v516_v40, %v524_v41 }
  0xab   : > { %1130 = vmatprep.subr.bf16.mxu0 %v1129_v45 }
  0xae   : > { %1132 = vmatpush1.bf16.msra.mxu0 %v1131_v48 }
  0xb1   : > { %593 = vmatmul.mubr.f32.vlgmr.msra.gmra.mrb[0].mxu0 %v448_v49 }
  0xb2   : > { %598 = vmatprep.mubr.f32.mxu0 %v1436_v0 }
  0xb5   : > { %599 = vmatmul.mubr.f32.gmra.mrb[2].mxu0 %v449_v50 }
  0xb6   : > { %604 = vmatprep.mubr.f32.mxu0 %v1436_v0 }
  0xb9   : > { %605 = vmatmul.mubr.f32.gmra.mrb[4].mxu0 %v450_v51 }
  0xba   : > { %610 = vmatprep.mubr.f32.mxu0 %v1436_v0  ;;  %v1139_v0 = vpack.c.bf16 %v487_v63, %v486_v62 }
  0xbc   : > { %1140 = vmatpush3.bf16.msra.mxu1 %v1139_v0 }
  0xbd   : > { %611 = vmatmul.mubr.f32.gmra.mrb[6].mxu0 %v451_v52  ;;  %1142 = vmatprep.subr.bf16.mxu1 %v1141_v3 }
  0xc0   : > { %1144 = vmatpush3.bf16.msra.mxu1 %v1143_v6 }
  0xc1   : > { %1146 = vmatprep.subr.bf16.mxu1 %v1145_v9 }
  0xc4   : > { %1148 = vmatpush3.bf16.msra.mxu1 %v1147_v12 }
  0xc5   : > { %1150 = vmatprep.subr.bf16.mxu1 %v1149_v15 }
  0xc8   : > { %1152 = vmatpush3.bf16.msra.mxu1 %v1151_v18 }
  0xc9   : > { %1154 = vmatprep.subr.bf16.mxu1 %v1153_v21 }
  0xcc   : > { %1156 = vmatpush3.bf16.msra.mxu1 %v1155_v24 }
  0xcd   : > { %1158 = vmatprep.subr.bf16.mxu1 %v1157_v27 }
  0xd0   : > { %1160 = vmatpush3.bf16.msra.mxu1 %v1159_v30 }
  0xd1   : > { %1162 = vmatprep.subr.bf16.mxu1 %v1161_v34 }
  0xd4   : > { %1164 = vmatpush3.bf16.msra.mxu1 %v1163_v36 }
 0x184   : > { %v594_v44 = vpop.f32.mrb[0].mxu0 }
 0x185   : > { %v1770_v45 = vadd.f32 %v594_v44, %v521_v42  ;;  %v596_v46 = vpop.f32.mrb[1].mxu0 }
 0x186   : > { %v1772_v47 = vadd.f32 %v596_v46, %v525_v43 }
 0x187   : > { %v617_v48 = vmul.f32 %v1770_v45, %v1770_v45 }
 0x188   : > { %v618_v49 = vmul.f32 %v1772_v47, %v1772_v47  ;;  %v600_v50 = vpop.f32.mrb[2].mxu0 }
 0x189   : > { %v625_v51 = vmul.f32 %v617_v48, %v1770_v45  ;;  %v1779_v52 = vadd.f32 %v600_v50, %v521_v42  ;;  %v602_v53 = vpop.f32.mrb[3].mxu0 }
 0x18a   : > { %v626_v54 = vmul.f32 %v618_v49, %v1772_v47  ;;  %v1782_v55 = vadd.f32 %v602_v53, %v525_v43 }
 0x18b   : > { %v633_v56 = vmul.f32 0.044715, %v625_v51  ;;  %v619_v57 = vmul.f32 %v1779_v52, %v1779_v52 }
 0x18c   : > { %v620_v58 = vmul.f32 %v1782_v55, %v1782_v55  ;;  %v606_v59 = vpop.f32.mrb[4].mxu0  ;;  %v634_v60 = vmul.f32 0.044715, %v626_v54 }
 0x18d   : > { %v641_v61 = vadd.f32 %v633_v56, %v1770_v45  ;;  %v627_v62 = vmul.f32 %v619_v57, %v1779_v52  ;;  %v1790_v63 = vadd.f32 %v606_v59, %v521_v42  ;;  %v608_v0 = vpop.f32.mrb[5].mxu0 }
 0x18e   : > { %v628_v1 = vmul.f32 %v620_v58, %v1782_v55  ;;  %v1793_v2 = vadd.f32 %v608_v0, %v525_v43  ;;  %v642_v3 = vadd.f32 %v634_v60, %v1772_v47 }
 0x18f   : > { %v649_v4 = vmul.f32 0.7978846, %v641_v61  ;;  %v635_v5 = vmul.f32 0.044715, %v627_v62  ;;  %v621_v6 = vmul.f32 %v1790_v63, %v1790_v63 }
 0x190   : > { %v636_v7 = vmul.f32 0.044715, %v628_v1  ;;  %v622_v8 = vmul.f32 %v1793_v2, %v1793_v2  ;;  %v612_v9 = vpop.f32.mrb[6].mxu0  ;;  %v650_v10 = vmul.f32 0.7978846, %v642_v3 }
 0x191   : > { %v643_v11 = vadd.f32 %v635_v5, %v1779_v52  ;;  %v629_v12 = vmul.f32 %v621_v6, %v1790_v63  ;;  %v1802_v13 = vadd.f32 %v612_v9, %v521_v42  ;;  %v614_v14 = vpop.f32.mrb[7].mxu0  ;;  %1259 = vtanh.f32 %v649_v4 }
 0x192   : > { %v644_v15 = vadd.f32 %v636_v7, %v1782_v55  ;;  %v630_v16 = vmul.f32 %v622_v8, %v1793_v2  ;;  %v615_v17 = vadd.f32 %v614_v14, %v525_v43  ;;  %1261 = vtanh.f32 %v650_v10  ;;  %v1046_v7 = vld [vmem:[%s437_s11] ss:$0 sm:$0xff] }
 0x193   : > { %v651_v18 = vmul.f32 0.7978846, %v643_v11  ;;  %v637_v19 = vmul.f32 0.044715, %v629_v12  ;;  %v623_v20 = vmul.f32 %v1802_v13, %v1802_v13 }
 0x194   : > { %v652_v21 = vmul.f32 0.7978846, %v644_v15  ;;  %v638_v22 = vmul.f32 0.044715, %v630_v16  ;;  %v624_v23 = vmul.f32 %v615_v17, %v615_v17 }
 0x195   : > { %v645_v24 = vadd.f32 %v637_v19, %v1790_v63  ;;  %v631_v25 = vmul.f32 %v623_v20, %v1802_v13  ;;  %1263 = vtanh.f32 %v651_v18 }
 0x196   : > { %v646_v26 = vadd.f32 %v638_v22, %v1793_v2  ;;  %v632_v27 = vmul.f32 %v624_v23, %v615_v17  ;;  %1265 = vtanh.f32 %v652_v21 }
 0x197   : > { %v653_v28 = vmul.f32 0.7978846, %v645_v24  ;;  %v639_v29 = vmul.f32 0.044715, %v631_v25 }
 0x198   : > { %v654_v30 = vmul.f32 0.7978846, %v646_v26  ;;  %v640_v31 = vmul.f32 0.044715, %v632_v27 }
 0x199   : > { %v647_v32 = vadd.f32 %v639_v29, %v1802_v13  ;;  %1267 = vtanh.f32 %v653_v28 }
 0x19a   : > { %v648_v33 = vadd.f32 %v640_v31, %v615_v17  ;;  %1269 = vtanh.f32 %v654_v30 }
 0x19b   : > { %v1260_v34 = vpop.eup %1259  ;;  %v655_v35 = vmul.f32 0.7978846, %v647_v32 }
 0x19c   : > { %v1262_v36 = vpop.eup %1261  ;;  %v656_v37 = vmul.f32 0.7978846, %v648_v33  ;;  %v665_v38 = vadd.f32 1.0, %v1260_v34 }
 0x19d   : > { %v666_v39 = vadd.f32 1.0, %v1262_v36  ;;  %1271 = vtanh.f32 %v655_v35 }
 0x19e   : > { %v673_v40 = vmul.f32 0.5, %v665_v38  ;;  %1273 = vtanh.f32 %v656_v37 }
 0x19f   : > { %v1264_v41 = vpop.eup %1263  ;;  %v674_v42 = vmul.f32 0.5, %v666_v39 }
 0x1a0   : > { %v1266_v43 = vpop.eup %1265  ;;  %v667_v44 = vadd.f32 1.0, %v1264_v41  ;;  %v681_v49 = vmul.f32 %v673_v40, %v1770_v45 }
 0x1a1   : > { %v682_v46 = vmul.f32 %v674_v42, %v1772_v47  ;;  %v668_v48 = vadd.f32 1.0, %v1266_v43 }
 0x1a2   : > { %v675_v50 = vmul.f32 0.5, %v667_v44 }
 0x1a3   : > { %v1268_v51 = vpop.eup %1267  ;;  %757 = vmatprep.mubr.f32.mxu1 %v682_v46  ;;  %v676_v53 = vmul.f32 0.5, %v668_v48 }
 0x1a4   : > { %v1270_v54 = vpop.eup %1269  ;;  %758 = vmatmul.mubr.f32.vlgmr.msra.gmra.mrb[0].mxu1 %v681_v49  ;;  %v669_v56 = vadd.f32 1.0, %v1268_v51  ;;  %v683_v59 = vmul.f32 %v675_v50, %v1779_v52 }
 0x1a5   : > { %v684_v57 = vmul.f32 %v676_v53, %v1782_v55  ;;  %v670_v58 = vadd.f32 1.0, %v1270_v54 }
 0x1a6   : > { %v677_v60 = vmul.f32 0.5, %v669_v56 }
 0x1a7   : > { %v1272_v61 = vpop.eup %1271  ;;  %762 = vmatprep.mubr.f32.mxu1 %v684_v57  ;;  %v678_v47 = vmul.f32 0.5, %v670_v58 }
 0x1a8   : > { %v1274_v62 = vpop.eup %1273  ;;  %763 = vmatmul.mubr.f32.gmra.mrb[2].mxu1 %v683_v59  ;;  %v671_v45 = vadd.f32 1.0, %v1272_v61  ;;  %v685_v3 = vmul.f32 %v677_v60, %v1790_v63 }
 0x1a9   : > { %v686_v0 = vmul.f32 %v678_v47, %v1793_v2  ;;  %v672_v1 = vadd.f32 1.0, %v1274_v62 }
 0x1aa   : > { %v679_v4 = vmul.f32 0.5, %v671_v45 }
 0x1ab   : > { %767 = vmatprep.mubr.f32.mxu1 %v686_v0  ;;  %v680_v55 = vmul.f32 0.5, %v672_v1 }
 0x1ac   : > { %768 = vmatmul.mubr.f32.gmra.mrb[4].mxu1 %v685_v3  ;;  %v687_v5 = vmul.f32 %v679_v4, %v1802_v13 }
 0x1ad   : > { %v688_v52 = vmul.f32 %v680_v55, %v615_v17 }
 0x1af   : > { %772 = vmatprep.mubr.f32.mxu1 %v688_v52 }
 0x1b0   : > { %773 = vmatmul.mubr.f32.gmra.mrb[6].mxu1 %v687_v5 }
 0x277   : > { %v1089_v2 = vpop.f32.mrb[0].mxu1 }
 0x278   : > { %v1090_v6 = vpop.f32.mrb[1].mxu1 }
 0x279   : > { %v1091_v63 = vadd.f32 %v1090_v6, %v1089_v2 }
 0x27b   : > { %v800_v8 = vadd.f32 %v1091_v63, %v1046_v7  ;;  %v1092_v9 = vpop.f32.mrb[2].mxu1 }
 0x27c   : > { %v1093_v10 = vpop.f32.mrb[3].mxu1 }
 0x27d   : > { %804 = vst [vmem:[%s429_s14] sm:$0xff] %v800_v8  ;;  %v1094_v11 = vadd.f32 %v1093_v10, %v1092_v9 }
 0x27f   : > { %v801_v12 = vadd.f32 %v1094_v11, %v1046_v7  ;;  %v1095_v13 = vpop.f32.mrb[4].mxu1 }
 0x280   : > { %v1096_v14 = vpop.f32.mrb[5].mxu1 }
 0x281   : > { %805 = vst [vmem:[%s429_s14 + $0x8] sm:$0xff] %v801_v12  ;;  %v1097_v15 = vadd.f32 %v1096_v14, %v1095_v13 }
 0x283   : > { %v802_v16 = vadd.f32 %v1097_v15, %v1046_v7  ;;  %v1098_v17 = vpop.f32.mrb[6].mxu1 }
 0x284   : > { %v1099_v18 = vpop.f32.mrb[7].mxu1 }
 0x285   : > { %806 = vst [vmem:[%s429_s14 + $0x10] sm:$0xff] %v802_v16  ;;  %v1100_v19 = vadd.f32 %v1099_v18, %v1098_v17 }
 0x287   : > { %v803_v20 = vadd.f32 %v1100_v19, %v1046_v7 }
 0x289   : > { %807 = vst [vmem:[%s429_s14 + $0x18] sm:$0xff] %v803_v20 }
 0x28a   : > { %s1056_s15 = sshll.u32 %s1413_s21, 8  ;;  %s839_s28 = sshll.u32 %s429_s14, 4  ;;  %s840_s28 = int_to_ptr.vmem [resolvable:$true] %s839_s28 }
 0x28b   : > { %s822_s0 = scalar_lea.hbm %s1872_s5, %s1056_s15  ;;  %s1437_s12 = smov 256  }
 0x28c   : > { %p1888_p0 = scmp.ne.s32.totalorder %s1882_s6, 0  ;;  %s1438_s29 = smov 1024  }
 0x28d   : > { %s1439_s26 = smov 2   ;;  %s1440_s25 = smov 128  }
 0x28e   : > { %1180 = sst [smem:[#allocation15]] (%p1888_p0), %s1437_s12  ;;  %s1441_s21 = smov 8  }
 0x28f   : > { %1181 = sst [smem:[#allocation15 + $0x1]] (%p1888_p0), %s1438_s29  ;;  %s1442_s10 = smov [#allocation14]  }
 0x290   : > { %1182 = sst [smem:[#allocation15 + $0x2]] (%p1888_p0), %s1439_s26  ;;  %s1443_s16 = smov 0  }
 0x291   : > { %1183 = sst [smem:[#allocation15 + $0x3]] (%p1888_p0), %s1440_s25 }
 0x292   : > { %1184 = sst [smem:[#allocation15 + $0x4]] (%p1888_p0), %s1440_s25 }
 0x293   : > { %1185 = sst [smem:[#allocation15 + $0x5]] (%p1888_p0), %s1441_s21 }
 0x294   : > { %1186 = dma.general (%p1888_p0), %s840_s28, 512, %s822_s0, %s809_s13, %s1442_s10, [#allocation15], %s1443_s16, 0  }
 0x295 PF: > { %p1192_p2 = scmp.ge.s32.totalorder %s1421_s23, 2  ;;  %s867_s24 = sand.u32 1, %s1401_s18  }
 0x296   : > { %p1889_p3 = scmp.ne.s32.totalorder %s1883_s8, 0  ;;  %s868_s30 = scalar_lea.sflag [#allocation5], %s867_s24 }
 0x298   : > { %p1189_p9 = pnand %p1192_p2, %p1889_p3 }
 0x29a   : > { %1396 = dma.done.wait (!%p1189_p9), %s868_s30, 512  }
 0x29b   : > { %1398 = vsyncadd (!%p1189_p9), %s868_s30, 4294966784  ;;  %s27_s23 = sadd.s32 1, %s1421_s23   ;;  %s1890_s6 = sld [smem:[#allocation21_spill]] }
 0x29c   : > { %p24_p11 = scmp.ge.s32.totalorder %s27_s23, 6   ;;  %s1891_s18 = smov %s1405_s19 }
 0x29d   : > { %s1892_s19 = smov %s1409_s20  ;;  %s1893_s20 = smov %s1534_s7 }
 0x29e   : > { %s1894_s21 = smov %s1417_s22  ;;  %26 = sbr.rel (!%p24_p11) target bundleno = 12 (0xc), region = 143 }
 0x2a1   : > { %s1895_s22 = smov %s1890_s6 }
 0x2a5   :  { %873 = vsyncpa [#allocation4], 1 }
 0x2a6   :  { %875 = vsyncpa [#allocation4 + $0x1], 1 }
 0x2a7   :  { %876 = vsyncpa [#allocation7], 1 }
 0x2a8   :  { %878 = vsyncpa [#allocation7 + $0x1], 1 }
 0x2a9   :  { %879 = vsyncpa [#allocation10], 1 }
 0x2aa   :  { %881 = vsyncpa [#allocation10 + $0x1], 1 }
 0x2ab   :  { %882 = vsyncpa [#allocation5], 1 }
 0x2ac   :  { %884 = vsyncpa [#allocation5 + $0x1], 1 }

</bundles_post_ra>
